<compile_context>
chip_gen: v7x
topology: tpu7x:2x2x1
jax: 0.10.0
libtpu: 0.0.40
codegen_flags: <defaults>
</compile_context>

<pallas_src>
import functools

import jax
import jax.numpy as jnp
from jax.experimental import pallas as pl
from jax.experimental.pallas import tpu as pltpu


# --------------------------------------------------------------------------
# Kernels
# --------------------------------------------------------------------------

def _se_fused_kernel(x_ref, w1_ref, w2t_ref, o_ref, *, inv_hw):
    """Pool + FC1/ReLU + FC2/sigmoid + scale for one batch tile, full (C, HW)."""
    x = x_ref[...]                                               # (Bt, C, HW) native

    # Squeeze: global average pool over the lane (spatial) axis; f32 accumulate.
    pooled = jnp.sum(x, axis=-1, keepdims=True,
                     dtype=jnp.float32) * inv_hw                 # (Bt, C, 1)

    # Excitation: tiny C x C//16 contractions -> VPU/XLU, not a padded MXU pass.
    w1 = w1_ref[...].astype(jnp.float32)                         # (C, C_red)
    h = jnp.maximum(jnp.sum(pooled * w1[None], axis=1), 0.0)     # (Bt, C_red)
    w2t = w2t_ref[...].astype(jnp.float32)                       # (C, C_red)
    y = jnp.sum(w2t[None] * h[:, None, :], axis=-1,
                keepdims=True)                                   # (Bt, C, 1)
    gate = jax.nn.sigmoid(y)                                     # f32

    # Scale: multiply in f32 (reference rounding), cast the product back.
    o_ref[...] = (x.astype(jnp.float32) * gate).astype(o_ref.dtype)


def _se_gate_kernel(x_ref, w1_ref, w2t_ref, g_ref, acc_ref, *, inv_hw):
    """HW-tiled pooling (accumulated in VMEM scratch) + excitation FCs."""
    hw_i = pl.program_id(1)

    @pl.when(hw_i == 0)
    def _():
        acc_ref[...] = jnp.zeros_like(acc_ref)

    acc_ref[...] += jnp.sum(x_ref[...], axis=-1, keepdims=True,
                            dtype=jnp.float32)                   # (Bt, C, 1)

    @pl.when(hw_i == pl.num_programs(1) - 1)
    def _():
        pooled = acc_ref[...] * inv_hw                           # (Bt, C, 1)
        w1 = w1_ref[...].astype(jnp.float32)                     # (C, C_red)
        h = jnp.maximum(jnp.sum(pooled * w1[None], axis=1), 0.0)
        w2t = w2t_ref[...].astype(jnp.float32)                   # (C, C_red)
        y = jnp.sum(w2t[None] * h[:, None, :], axis=-1, keepdims=True)
        g_ref[...] = jax.nn.sigmoid(y)                           # (Bt, C, 1) f32


def _se_scale_kernel(x_ref, g_ref, o_ref):
    """HW-tiled broadcast scale — the dominant, HBM-bound pass."""
    gate = g_ref[...]                                            # (Bt, C, 1) f32
    o_ref[...] = (x_ref[...].astype(jnp.float32) * gate).astype(o_ref.dtype)


# --------------------------------------------------------------------------
# Tiling / VMEM budgeting helpers
# --------------------------------------------------------------------------

_LIMIT_FLOOR = 16 << 20     # never report a limit below this (internal scratch etc.)
_HEADROOM = 4 << 20         # slack on top of the computed footprint


def _vmem_capacity_bytes():
    """Per-TensorCore VMEM capacity (generation-aware), with a safe fallback."""
    try:
        info = pltpu.get_tpu_info()
        cap = getattr(info, "vmem_capacity_bytes", None)
        if cap:
            return int(cap)
    except Exception:
        pass
    return 64 << 20   # conservative default = v7x per-TC VMEM


def _working_set_budget(vmem_cap):
    """Total budget for the 2-in + 2-out double-buffered working set.

    v7x (64 MiB/TC)  -> 32 MiB total (~8 MiB per buffer)
    v5e/v6e (128 MiB) -> 48 MiB total (~12 MiB per buffer)
    """
    return min(vmem_cap // 2, 48 << 20)


def _vmem_limit(footprint_bytes, vmem_cap):
    return int(min(max(footprint_bytes + _HEADROOM, _LIMIT_FLOOR), vmem_cap))


def _pick_batch_tile(B, per_sample_block_bytes, per_buffer_budget):
    """Largest divisor of B whose block fits the per-buffer budget, while keeping
    >= 4 grid steps when B >= 4 (>= 2 per v7x TensorCore) and >= 2 when B >= 2."""
    cap = max(1, per_buffer_budget // max(1, per_sample_block_bytes))
    if B >= 4:
        cap = min(cap, B // 4)
    elif B >= 2:
        cap = min(cap, B // 2)
    cap = max(1, min(cap, B))
    for bt in range(cap, 0, -1):
        if B % bt == 0:
            return bt
    return 1


def _pick_hw_tile(HW, bytes_per_hw, per_buffer_budget):
    """Largest multiple-of-128 divisor of HW whose (C, HWt) block fits the budget
    (lane-dense, layout-legal blocks). Falls back to the full spatial extent."""
    best = None
    t = 128
    while t <= HW:
        if HW % t == 0 and t * bytes_per_hw <= per_buffer_budget:
            best = t
        t += 128
    if best is not None:
        return best
    # TODO(synk): channels-last (B, HW, C) layout when HW has no multiple-of-128
    # divisor but C does (late-stage 7x7/14x14 maps) to keep stores lane-dense.
    return HW


# --------------------------------------------------------------------------
# Wrapper
# --------------------------------------------------------------------------

def se_block(x, w1, w2, *, batch_tile=None, hw_tile=None, force_split=False):
    """SEBlock forward.

    x : (B, C, H, W)   NCHW, matching the PyTorch module.
    w1: (C, C_red)     fc[0].weight.T  (Linear(C, C//reduction, bias=False))
    w2: (C_red, C)     fc[2].weight.T  (Linear(C//reduction, C, bias=False))
    returns (B, C, H, W)
    """
    B, C, H, W = x.shape
    HW = H * W
    C_red = w1.shape[1]
    itemsize = x.dtype.itemsize

    x_flat = x.reshape(B, C, HW)
    w2t = jnp.swapaxes(w2, 0, 1)          # (C, C_red): keeps C in sublanes in-kernel
    weight_bytes = 2 * C * C_red * 4      # both tiny weight tiles, f32 upper bound

    vmem_cap = _vmem_capacity_bytes()
    total_budget = _working_set_budget(vmem_cap)
    per_buf_budget = total_budget // 4    # 2 double-buffered inputs + 2 outputs

    sample_bytes = C * HW * itemsize
    use_split = force_split or (sample_bytes > per_buf_budget)

    if not use_split:
        # ------------------------------------------------------------------
        # Fused single-pass path: one grid step handles a (Bt, C, HW) tile.
        # ------------------------------------------------------------------
        Bt = batch_tile if batch_tile is not None else _pick_batch_tile(
            B, sample_bytes, per_buf_budget)
        assert B % Bt == 0, "batch_tile must divide B"

        footprint = 4 * Bt * sample_bytes + 2 * weight_bytes
        kernel = functools.partial(_se_fused_kernel, inv_hw=float(1.0 / HW))

        out = pl.pallas_call(
            kernel,
            out_shape=jax.ShapeDtypeStruct((B, C, HW), x.dtype),
            grid_spec=pltpu.PrefetchScalarGridSpec(
                num_scalar_prefetch=0,
                grid=(B // Bt,),
                in_specs=[
                    # Last two block dims equal the full (C, HW) extents ->
                    # layout-legal for any C/HW; HW (lanes) is the fast axis.
                    pl.BlockSpec((Bt, C, HW), lambda b: (b, 0, 0)),
                    pl.BlockSpec((C, C_red), lambda b: (0, 0)),
                    pl.BlockSpec((C, C_red), lambda b: (0, 0)),
                ],
                out_specs=pl.BlockSpec((Bt, C, HW), lambda b: (b, 0, 0)),
            ),
            compiler_params=pltpu.CompilerParams(
                dimension_semantics=("parallel",),
                vmem_limit_bytes=_vmem_limit(footprint, vmem_cap)),
        )(x_flat, w1, w2t)
        return out.reshape(B, C, H, W)

    # ----------------------------------------------------------------------
    # HW-tiled two-kernel path for large feature maps.
    # ----------------------------------------------------------------------
    if hw_tile is None:
        hw_tile = _pick_hw_tile(HW, C * itemsize, per_buf_budget)
    assert HW % hw_tile == 0, "hw_tile must divide H*W"
    n_hw = HW // hw_tile

    block_bytes = C * hw_tile * itemsize
    Bt = batch_tile if batch_tile is not None else _pick_batch_tile(
        B, block_bytes, per_buf_budget)
    assert B % Bt == 0, "batch_tile must divide B"
    gate_block_bytes = Bt * C * 4

    # Pass 1: pooled-sum accumulated over the HW grid axis, FCs + sigmoid at the
    # last HW step -> (B, C, 1) gate (C stays in the sublane axis).
    gate_footprint = (2 * Bt * block_bytes + 2 * weight_bytes
                      + 3 * gate_block_bytes)
    gate = pl.pallas_call(
        functools.partial(_se_gate_kernel, inv_hw=float(1.0 / HW)),
        out_shape=jax.ShapeDtypeStruct((B, C, 1), jnp.float32),
        grid_spec=pltpu.PrefetchScalarGridSpec(
            num_scalar_prefetch=0,
            grid=(B // Bt, n_hw),
            in_specs=[
                pl.BlockSpec((Bt, C, hw_tile), lambda b, h: (b, 0, h)),
                pl.BlockSpec((C, C_red), lambda b, h: (0, 0)),
                pl.BlockSpec((C, C_red), lambda b, h: (0, 0)),
            ],
            out_specs=pl.BlockSpec((Bt, C, 1), lambda b, h: (b, 0, 0)),
            scratch_shapes=[pltpu.VMEM((Bt, C, 1), jnp.float32)],
        ),
        compiler_params=pltpu.CompilerParams(
            dimension_semantics=("parallel", "arbitrary"),
            vmem_limit_bytes=_vmem_limit(gate_footprint, vmem_cap)),
    )(x_flat, w1, w2t)

    # Pass 2: lane-dense broadcast scale over (Bt, C, HWt) tiles.
    scale_footprint = 4 * Bt * block_bytes + 2 * gate_block_bytes
    out = pl.pallas_call(
        _se_scale_kernel,
        out_shape=jax.ShapeDtypeStruct((B, C, HW), x.dtype),
        grid_spec=pltpu.PrefetchScalarGridSpec(
            num_scalar_prefetch=0,
            grid=(B // Bt, n_hw),
            in_specs=[
                pl.BlockSpec((Bt, C, hw_tile), lambda b, h: (b, 0, h)),
                pl.BlockSpec((Bt, C, 1), lambda b, h: (b, 0, 0)),
            ],
            out_specs=pl.BlockSpec((Bt, C, hw_tile), lambda b, h: (b, 0, h)),
        ),
        compiler_params=pltpu.CompilerParams(
            dimension_semantics=("parallel", "parallel"),
            vmem_limit_bytes=_vmem_limit(scale_footprint, vmem_cap)),
    )(x_flat, gate)

    return out.reshape(B, C, H, W)


def se_block_ref(x, w1, w2):
    """Pure-JAX reference mirroring the PyTorch forward."""
    pooled = jnp.mean(x.astype(jnp.float32), axis=(2, 3))          # (B, C)
    h = jnp.maximum(pooled @ w1.astype(jnp.float32), 0.0)          # (B, C_red)
    y = jax.nn.sigmoid(h @ w2.astype(jnp.float32))                 # (B, C)
    return (x.astype(jnp.float32) * y[:, :, None, None]).astype(x.dtype)


if __name__ == "__main__":
    # Module config: SEBlock(channels=32, reduction=16) -> hidden = 2
    B, C, H, W = 2, 32, 16, 16
    reduction = 16
    C_red = C // reduction

    key = jax.random.PRNGKey(0)
    kx, k1, k2 = jax.random.split(key, 3)

    x = jax.random.normal(kx, (B, C, H, W), dtype=jnp.float32)
    # Deterministic synthetic weights (Linear has bias=False in the module).
    w1 = jax.random.normal(k1, (C, C_red), dtype=jnp.float32) * 0.1
    w2 = jax.random.normal(k2, (C_red, C), dtype=jnp.float32) * 0.1

    ref = jax.block_until_ready(se_block_ref(x, w1, w2))

    # Fused single-pass path (small feature maps).
    out = jax.block_until_ready(se_block(x, w1, w2))
    assert out.shape == (B, C, H, W)
    assert jnp.allclose(out, ref, atol=1e-5, rtol=1e-5), "fused path mismatch"

    # HW-tiled two-kernel path (chosen automatically for large feature maps;
    # forced here so both code paths are exercised and checked).
    out_split = jax.block_until_ready(
        se_block(x, w1, w2, force_split=True, hw_tile=128))
    assert jnp.allclose(out_split, ref, atol=1e-5, rtol=1e-5), "split path mismatch"

    print("KERNEL_OK")
</pallas_src>

<mosaic_0001>
module attributes {stable_mosaic.version = 11 : i64} {
  func.func @_se_fused_kernel(%arg0: i32, %arg1: memref<1x32x256xf32, #tpu.memory_space<vmem>>, %arg2: memref<32x2xf32, #tpu.memory_space<vmem>>, %arg3: memref<32x2xf32, #tpu.memory_space<vmem>>, %arg4: memref<1x32x256xf32, #tpu.memory_space<vmem>>) attributes {dimension_semantics = [#tpu.dimension_semantics<parallel>], iteration_bounds = array<i64: 2>, scalar_prefetch = 0 : i64, scratch_operands = 0 : i64, tpu.core_type = #tpu.core_type<tc>, window_params = [{transform_indices = @transform_0, window_bounds = array<i64: 1, 32, 256>}, {pipeline_mode = #tpu.pipeline_mode<synchronous>, transform_indices = @transform_1, window_bounds = array<i64: 32, 2>}, {pipeline_mode = #tpu.pipeline_mode<synchronous>, transform_indices = @transform_2, window_bounds = array<i64: 32, 2>}, {transform_indices = @transform_3, window_bounds = array<i64: 1, 32, 256>}]} {
    %c0 = arith.constant 0 : index
    %c0_0 = arith.constant 0 : index
    %c0_1 = arith.constant 0 : index
    %0 = vector.load %arg1[%c0, %c0_0, %c0_1] : memref<1x32x256xf32, #tpu.memory_space<vmem>>, vector<1x32x256xf32>
    %cst = arith.constant dense<0.000000e+00> : vector<1x32xf32>
    %1 = vector.multi_reduction <add>, %0, %cst [2] : vector<1x32x256xf32> to vector<1x32xf32>
    %2 = vector.shape_cast %1 : vector<1x32xf32> to vector<1x32x1xf32>
    %cst_2 = arith.constant 3.906250e-03 : f32
    %3 = vector.broadcast %cst_2 : f32 to vector<1x32x1xf32>
    %4 = arith.mulf %2, %3 : vector<1x32x1xf32>
    %c0_3 = arith.constant 0 : index
    %c0_4 = arith.constant 0 : index
    %5 = vector.load %arg2[%c0_3, %c0_4] : memref<32x2xf32, #tpu.memory_space<vmem>>, vector<32x2xf32>
    %6 = vector.shape_cast %5 : vector<32x2xf32> to vector<1x32x2xf32>
    %7 = vector.broadcast %4 : vector<1x32x1xf32> to vector<1x32x2xf32>
    %8 = arith.mulf %7, %6 : vector<1x32x2xf32>
    %cst_5 = arith.constant dense<0.000000e+00> : vector<1x2xf32>
    %9 = vector.multi_reduction <add>, %8, %cst_5 [1] : vector<1x32x2xf32> to vector<1x2xf32>
    %cst_6 = arith.constant 0.000000e+00 : f32
    %10 = vector.broadcast %cst_6 : f32 to vector<1x2xf32>
    %11 = arith.maximumf %9, %10 : vector<1x2xf32>
    %c0_7 = arith.constant 0 : index
    %c0_8 = arith.constant 0 : index
    %12 = vector.load %arg3[%c0_7, %c0_8] : memref<32x2xf32, #tpu.memory_space<vmem>>, vector<32x2xf32>
    %13 = vector.shape_cast %12 : vector<32x2xf32> to vector<1x32x2xf32>
    %14 = vector.shape_cast %11 : vector<1x2xf32> to vector<1x1x2xf32>
    %15 = vector.broadcast %14 : vector<1x1x2xf32> to vector<1x32x2xf32>
    %16 = arith.mulf %13, %15 : vector<1x32x2xf32>
    %cst_9 = arith.constant dense<0.000000e+00> : vector<1x32xf32>
    %17 = vector.multi_reduction <add>, %16, %cst_9 [2] : vector<1x32x2xf32> to vector<1x32xf32>
    %18 = vector.shape_cast %17 : vector<1x32xf32> to vector<1x32x1xf32>
    %19 = arith.negf %18 : vector<1x32x1xf32>
    %20 = math.exp %19 : vector<1x32x1xf32>
    %cst_10 = arith.constant 1.000000e+00 : f32
    %21 = vector.broadcast %cst_10 : f32 to vector<1x32x1xf32>
    %22 = arith.addf %21, %20 : vector<1x32x1xf32>
    %23 = arith.divf %21, %22 : vector<1x32x1xf32>
    %24 = vector.broadcast %23 : vector<1x32x1xf32> to vector<1x32x256xf32>
    %25 = arith.mulf %0, %24 : vector<1x32x256xf32>
    %c0_11 = arith.constant 0 : index
    %c0_12 = arith.constant 0 : index
    %c0_13 = arith.constant 0 : index
    %26 = vector.load %arg4[%c0_11, %c0_12, %c0_13] : memref<1x32x256xf32, #tpu.memory_space<vmem>>, vector<1x32x256xf32>
    tpu.vector_store %arg4[%c0_11, %c0_12, %c0_13], %25 {strides = array<i32>} : memref<1x32x256xf32, #tpu.memory_space<vmem>>, vector<1x32x256xf32>,
    return
  }
  func.func @transform_0(%arg0: i32) -> (i32, i32, i32) {
    %c0_i32 = arith.constant 0 : i32
    %c0_i32_0 = arith.constant 0 : i32
    %c0_i32_1 = arith.constant 0 : i32
    return %arg0, %c0_i32, %c0_i32_0 : i32, i32, i32
  }
  func.func @transform_1(%arg0: i32) -> (i32, i32) {
    %c0_i32 = arith.constant 0 : i32
    %c0_i32_0 = arith.constant 0 : i32
    %c0_i32_1 = arith.constant 0 : i32
    return %c0_i32, %c0_i32_0 : i32, i32
  }
  func.func @transform_2(%arg0: i32) -> (i32, i32) {
    %c0_i32 = arith.constant 0 : i32
    %c0_i32_0 = arith.constant 0 : i32
    %c0_i32_1 = arith.constant 0 : i32
    return %c0_i32, %c0_i32_0 : i32, i32
  }
  func.func @transform_3(%arg0: i32) -> (i32, i32, i32) {
    %c0_i32 = arith.constant 0 : i32
    %c0_i32_0 = arith.constant 0 : i32
    %c0_i32_1 = arith.constant 0 : i32
    return %arg0, %c0_i32, %c0_i32_0 : i32, i32, i32
  }
}

</mosaic_0001>

<bundles_post_ra>
// kernel: tpu_custom_call.1
= control target key start
LH: loop header
LB: loop body
LE: loop exit
PB: predicated region body
PF: predicated region fallthrough
CT: control target
= control target key end

     0   :  { %8 = vsyncpa [#allocation3], 0  ;;  %s823_s0 = inlined_call_operand.hbm [shape: f32[2,32,256], index: 0, kind: input, shape index: {}]   ;;  %s824_s1 = inlined_call_operand.vmem [shape: f32[32,2], index: 1, kind: input, shape index: {}]   ;;  %s825_s2 = inlined_call_operand.vmem [shape: f32[32,2], index: 2, kind: input, shape index: {}]   ;;  %s826_s3 = inlined_call_operand.hbm [shape: f32[2,32,256], index: 3, kind: output, shape index: {}]  }
   0x1   :  { %10 = vsyncpa [#allocation3 + $0x1], 0 }
   0x2   :  { %11 = vsyncpa [#allocation4], 0 }
   0x3   :  { %13 = vsyncpa [#allocation4 + $0x1], 0  ;;  %s593_s12 = smov 0   ;;  %s595_s13 = smov 0  }
   0x4   :  { %s597_s14 = smov 0   ;;  %s599_s15 = smov 0  }
   0x5 LB: > { %s614_s16 = sadd.s32 4294967295, %s565_s15   ;;  %s383_s17 = sadd.s32 4294967294, %s565_s15   ;;  %s565_s15 = sphi %s599_s15, %s839_s15   ;;  %s561_s14 = sphi %s597_s14, %s838_s14   ;;  %s557_s13 = sphi %s595_s13, %s837_s13   ;;  %s553_s12 = sphi %s593_s12, %s836_s12  }
   0x6   : > { %s618_s18 = sadd.s32 1, %s565_s15   ;;  %s26_s19 = sadd.s32 1, %s561_s14 }
   0x7   : > { %s23_s20 = ssub.s32 %s565_s15, %s618_s18  ;;  %p33_p0 = scmp.ne.s32.totalorder %s561_s14, %s557_s13 }
   0x8   : > { %p24_p1 = scmp.eq.s32.totalorder %s23_s20, 0  ;;  %p34_p2 = scmp.eq.s32.totalorder %s565_s15, 0 }
   0x9   : > { %p39_p3 = scmp.ne.s32.totalorder %s557_s13, %s553_s12  ;;  %p40_p4 = scmp.eq.s32.totalorder %s614_s16, 0 }
   0xa   : > { %s630_s21 = scalar_select %p24_p1, %s561_s14, %s26_s19  }
   0xb   : > { %p632_p5 = por %p34_p2, %p33_p0  ;;  %p636_p6 = por %p40_p4, %p39_p3 }
   0xc   : > { %p105_p7 = scmp.eq.s32.totalorder %s614_s16, 1  ;;  %p111_p8 = scmp.eq.s32.totalorder %s383_s17, 1 }
   0xd   : > { %p415_p10 = scmp.lt.s32.totalorder %s565_s15, 2  ;;  %s137_s26 = sand.u32 1, %s561_s14  }
   0xe   : > { %p643_p11 = por %p105_p7, %p33_p0  ;;  %p647_p12 = por %p111_p8, %p39_p3 }
   0xf   : > { %s401_s27 = sshll.u32 %s565_s15, 10  ;;  %s386_s28 = sshll.u32 %s137_s26, 6 }
  0x10   : > { %s830_s24 = scalar_select %p643_p11, 1, 0 }
  0x11   : > { %s831_s25 = scalar_select %p647_p12, 1, 0 }
  0x12   : > { %s656_s4 = scalar_lea.hbm %s823_s0, %s401_s27  ;;  %s141_s5 = scalar_lea.vmem [#allocation2], %s386_s28 }
  0x13   : > { %s148_s6 = sshll.u32 %s141_s5, 4  ;;  %p660_p13 = pnand %p415_p10, %p632_p5  ;;  %s664_s6 = int_to_ptr.vmem [resolvable:$true] %s148_s6 }
  0x14   : > { %s666_s8 = scalar_lea.sflag [#allocation3], %s137_s26  ;;  %s469_s9 = scalar_lea.hbm %s656_s4, 1024 }
  0x15   : > { %p470_p0 = scmp.ne.s32.totalorder %s656_s4, %s469_s9  ;;  %p471_p1 = pneg %p660_p13 }
  0x16   : > { %s474_s17 = scalar_lea.hbm %s823_s0, 2048  ;;  %p475_p4 = scmp.lt.u32.totalorder %s656_s4, %s823_s0 }
  0x17   : > { %p472_p2 = pnand %p471_p1, %p470_p0  ;;  %p476_p5 = scmp.lt.u32.totalorder %s474_s17, %s469_s9 }
  0x18   : > { %p478_p8 = scmp.lt.u32.totalorder %s469_s9, %s656_s4 }
  0x19   : > { %p473_p3 = pneg %p472_p2  ;;  %p477_p7 = por %p476_p5, %p475_p4 }
  0x1b   : > { %p479_p10 = por %p478_p8, %p477_p7 }
  0x1d   : > { %p480_p9 = pnand %p479_p10, %p473_p3 }
  0x1f   : > { %483 = shalt.err (!%p480_p9)
}
  0x20   : > { %s484_s22 = scalar_lea.vmem %s664_s6, 1024  ;;  %s567_s26 = smov [#allocation2]  }
  0x21   : > { %p485_p0 = scmp.ne.s32.totalorder %s664_s6, %s484_s22  ;;  %s489_s27 = sshll.u32 %s567_s26, 4  ;;  %s490_s27 = int_to_ptr.vmem [resolvable:$false] %s489_s27 }
  0x22   : > { %s491_s28 = scalar_lea.vmem %s490_s27, 2048  ;;  %p492_p11 = scmp.lt.s32.totalorder %s664_s6, %s490_s27 }
  0x23   : > { %p487_p2 = pnand %p485_p0, %p471_p1  ;;  %p493_p4 = scmp.lt.s32.totalorder %s491_s28, %s484_s22 }
  0x25   : > { %p488_p12 = pneg %p487_p2  ;;  %p494_p5 = por %p493_p4, %p492_p11 }
  0x27   : > { %p495_p7 = pnand %p494_p5, %p488_p12 }
  0x29   : > { %498 = shalt.err (!%p495_p7)
}
  0x2a   : > { %s568_s29 = smov 256   ;;  %s569_s30 = smov 16  }
  0x2b   : > { %410 = dma.hbm_to_vmem [thread:$0]  (!%p660_p13), %s656_s4, 1024, %s664_s6, %s666_s8, %s568_s29, %s568_s29, %s569_s30  }
  0x2c   : > { %p389_p9 = scmp.ge.s32.totalorder %s565_s15, 1  ;;  %p156_p1 = scmp.lt.s32.totalorder %s565_s15, 3 }
  0x2e   : > { %p157_p3 = pnand %p389_p9, %p156_p1 }
  0x2f   : > { %s697_s5 = sand.u32 (!%p157_p3), 1, %s557_s13  }
  0x30   : > { %160 = sbr.rel (%p157_p3) target bundleno = 423 (0x1a7), region = 32  ;;  %s390_s9 = sshll.u32 (!%p157_p3), %s697_s5, 6 }
  0x31   : > { %s163_s10 = scalar_lea.sflag (!%p157_p3), [#allocation3], %s697_s5  ;;  %s166_s11 = scalar_lea.vmem (!%p157_p3), [#allocation2], %s390_s9 }
  0x37   : > { %544 = dma.done.wait (%p636_p6), %s163_s10, 1024  }
  0x38   : > { %546 = vsyncadd (%p636_p6), %s163_s10, 4294966272  ;;  %v707_v0 = vld [vmem:[%s166_s11] sm:$0xff]  ;;  %v709_v1 = vld [vmem:[%s166_s11 + $0x8] sm:$0xff]  ;;  %vm221_vm0 = vcmask 15360   ;;  %s402_s23 = sshll.u32 %s614_s16, 10  ;;  %s188_s4 = scalar_lea.vmem [#allocation5], %s390_s9 }
  0x39   : > { %v711_v2 = vld [vmem:[%s166_s11 + $0x20] sm:$0xff]  ;;  %v197_v3 = vadd.f32 %v709_v1, %v707_v0  ;;  %v715_v4 = vld [vmem:[%s166_s11 + $0x28] sm:$0xff]  ;;  %v717_v5 = vld [vmem:[%s166_s11 + $0x10] sm:$0xff]  ;;  %s310_s6 = sshll.u32 %s188_s4, 4  ;;  %s775_s17 = scalar_lea.hbm %s826_s3, %s402_s23  ;;  %s777_s6 = int_to_ptr.vmem [resolvable:$true] %s310_s6 }
  0x3a   : > { %v719_v6 = vld [vmem:[%s166_s11 + $0x18] sm:$0xff]  ;;  %v203_v7 = vadd.f32 %v715_v4, %v711_v2  ;;  %v723_v8 = vld [vmem:[%s166_s11 + $0x30] sm:$0xff]  ;;  %v213_v15 = vld [vmem:[%s824_s1] sm:$0xff]  ;;  %s297_s16 = scalar_lea.sflag [#allocation4], %s697_s5  ;;  %s499_s9 = scalar_lea.vmem %s777_s6, 1024 }
  0x3b   : > { %v725_v9 = vld [vmem:[%s166_s11 + $0x38] sm:$0xff]  ;;  %198 = vadd.xlane.f32.xlu0 %v197_v3  ;;  %v200_v10 = vadd.f32 %v719_v6, %v717_v5  ;;  %v215_v17 = vld [vmem:[%s824_s1 + $0x10] sm:$0xff]  ;;  %v214_v18 = vld [vmem:[%s824_s1 + $0x8] sm:$0xff]  ;;  %p500_p6 = scmp.ne.s32.totalorder %s777_s6, %s499_s9  ;;  %p833_p11 = scmp.ne.s32.totalorder %s830_s24, 0 }
  0x3c   : > { %204 = vadd.xlane.f32.xlu1 %v203_v7  ;;  %v206_v11 = vadd.f32 %v725_v9, %v723_v8  ;;  %v216_v22 = vld [vmem:[%s824_s1 + $0x18] sm:$0xff]  ;;  %v237_v41 = vld [vmem:[%s825_s2 + $0x8] sm:$0xff]  ;;  %v236_v42 = vld [vmem:[%s825_s2] sm:$0xff]  ;;  %s570_s19 = smov [#allocation5]  }
  0x3d   : > { %v239_v44 = vld [vmem:[%s825_s2 + $0x18] sm:$0xff]  ;;  %v238_v45 = vld [vmem:[%s825_s2 + $0x10] sm:$0xff]  ;;  %p501_p12 = pnand %p500_p6, %p833_p11  ;;  %s503_s20 = sshll.u32 %s570_s19, 4  ;;  %s504_s20 = int_to_ptr.vmem [resolvable:$false] %s503_s20 }
  0x3e   : > { %s505_s22 = scalar_lea.vmem %s504_s20, 2048  ;;  %p506_p8 = scmp.lt.s32.totalorder %s777_s6, %s504_s20 }
  0x3f   : > { %201 = vadd.xlane.f32.xlu0 %v200_v10  ;;  %p502_p13 = pneg %p501_p12  ;;  %p507_p10 = scmp.lt.s32.totalorder %s505_s22, %s499_s9 }
  0x40   : > { %207 = vadd.xlane.f32.xlu1 %v206_v11 }
  0x41   : > { %p508_p0 = por %p507_p10, %p506_p8 }
  0x43   : > { %p509_p2 = pnand %p508_p0, %p502_p13 }
  0xc8   : > { %v199_v12 = vpop.xlane.xlu0 %198 }
  0xc9   : > { %v209_v13 = vmul.f32 0.00390625, %v199_v12  ;;  %v205_v14 = vpop.xlane.xlu1 %204 }
  0xca   : > { %v211_v16 = vmul.f32 0.00390625, %v205_v14 }
  0xcb   : > { %v217_v20 = vmul.f32 %v213_v15, %v209_v13 }
  0xcc   : > { %v202_v19 = vpop.xlane.xlu0 %201  ;;  %v219_v25 = vmul.f32 %v215_v17, %v211_v16 }
  0xcd   : > { %v210_v21 = vmul.f32 0.00390625, %v202_v19  ;;  %v208_v23 = vpop.xlane.xlu1 %207  ;;  %v222_v28 = vsel %vm221_vm0, %v217_v20, 0.0 }
  0xce   : > { %v212_v24 = vmul.f32 0.00390625, %v208_v23  ;;  %v225_v31 = vsel %vm221_vm0, %v219_v25, 0.0 }
  0xcf   : > { %v218_v26 = vmul.f32 %v214_v18, %v210_v21 }
  0xd0   : > { %v220_v27 = vmul.f32 %v216_v22, %v212_v24 }
  0xd1   : > { %v223_v29 = vsel %vm221_vm0, %v218_v26, 0.0 }
  0xd2   : > { %v224_v30 = vadd.f32 %v223_v29, %v222_v28  ;;  %v227_v32 = vsel %vm221_vm0, %v220_v27, 0.0 }
  0xd4   : > { %v226_v33 = vadd.f32 %v225_v31, %v224_v30 }
  0xd6   : > { %v228_v34 = vadd.f32 %v227_v32, %v226_v33 }
  0xd8   : > { %v229_v35 = vrot.slane %v228_v34, 4 }
  0xda   : > { %v230_v36 = vadd.f32 %v229_v35, %v228_v34 }
  0xdc   : > { %v231_v37 = vrot.slane %v230_v36, 2 }
  0xde   : > { %v232_v38 = vadd.f32 %v231_v37, %v230_v36 }
  0xe0   : > { %v233_v39 = vrot.slane %v232_v38, 1 }
  0xe2   : > { %v234_v40 = vadd.f32 %v233_v39, %v232_v38 }
  0xe4   : > { %v235_v43 = vmax.f32 %v234_v40, 0.0 }
  0xe6   : > { %v241_v46 = vmul.f32 %v237_v41, %v235_v43  ;;  %v240_v47 = vmul.f32 %v236_v42, %v235_v43  ;;  %v243_v50 = vmul.f32 %v239_v44, %v235_v43  ;;  %v242_v51 = vmul.f32 %v238_v45, %v235_v43 }
  0xe8   : > { %v247_v48 = vsel %vm221_vm0, %v241_v46, 0.0  ;;  %v244_v49 = vsel %vm221_vm0, %v240_v47, 0.0  ;;  %v253_v52 = vsel %vm221_vm0, %v243_v50, 0.0  ;;  %v250_v53 = vsel %vm221_vm0, %v242_v51, 0.0 }
  0xe9   : > { %248 = vadd.xlane.f32.xlu1 %v247_v48  ;;  %245 = vadd.xlane.f32.xlu0 %v244_v49 }
  0xed   : > { %254 = vadd.xlane.f32.xlu1 %v253_v52  ;;  %251 = vadd.xlane.f32.xlu0 %v250_v53 }
 0x176   : > { %v249_v54 = vpop.xlane.xlu1 %248  ;;  %v246_v55 = vpop.xlane.xlu0 %245 }
 0x177   : > { %v393_v56 = vmul.f32 -1.442695, %v249_v54  ;;  %v392_v57 = vmul.f32 -1.442695, %v246_v55 }
 0x179   : > { %453 = vpow2.f32 %v393_v56 }
 0x17a   : > { %455 = vpow2.f32 %v392_v57  ;;  %v255_v58 = vpop.xlane.xlu1 %254  ;;  %v252_v59 = vpop.xlane.xlu0 %251 }
 0x17b   : > { %v395_v60 = vmul.f32 -1.442695, %v255_v58  ;;  %v394_v61 = vmul.f32 -1.442695, %v252_v59 }
 0x17d   : > { %457 = vpow2.f32 %v395_v60 }
 0x17e   : > { %459 = vpow2.f32 %v394_v61 }
 0x183   : > { %v454_v62 = vpop.eup %453 }
 0x184   : > { %v456_v63 = vpop.eup %455  ;;  %v269_v3 = vadd.f32 1.0, %v454_v62 }
 0x185   : > { %v268_v7 = vadd.f32 1.0, %v456_v63 }
 0x186   : > { %461 = vrcp.f32 %v269_v3 }
 0x187   : > { %v458_v10 = vpop.eup %457  ;;  %463 = vrcp.f32 %v268_v7 }
 0x188   : > { %v460_v11 = vpop.eup %459  ;;  %v271_v12 = vadd.f32 1.0, %v458_v10 }
 0x189   : > { %v270_v13 = vadd.f32 1.0, %v460_v11 }
 0x18a   : > { %465 = vrcp.f32 %v271_v12 }
 0x18b   : > { %467 = vrcp.f32 %v270_v13 }
 0x190   : > { %v462_v14 = vpop.eup %461 }
 0x191   : > { %v464_v15 = vpop.eup %463  ;;  %v282_v16 = vmul.f32 %v462_v14, %v717_v5  ;;  %v283_v17 = vmul.f32 %v462_v14, %v719_v6 }
 0x192   : > { %v280_v18 = vmul.f32 %v464_v15, %v707_v0  ;;  %v281_v19 = vmul.f32 %v464_v15, %v709_v1 }
 0x193   : > { %290 = vst [vmem:[%s188_s4 + $0x10] sm:$0xff] %v282_v16  ;;  %291 = vst [vmem:[%s188_s4 + $0x18] sm:$0xff] %v283_v17 }
 0x194   : > { %v466_v20 = vpop.eup %465  ;;  %288 = vst [vmem:[%s188_s4] sm:$0xff] %v280_v18  ;;  %289 = vst [vmem:[%s188_s4 + $0x8] sm:$0xff] %v281_v19 }
 0x195   : > { %v468_v21 = vpop.eup %467  ;;  %v286_v5 = vmul.f32 %v466_v20, %v723_v8  ;;  %v287_v6 = vmul.f32 %v466_v20, %v725_v9 }
 0x196   : > { %v284_v0 = vmul.f32 %v468_v21, %v711_v2  ;;  %v285_v1 = vmul.f32 %v468_v21, %v715_v4 }
 0x197   : > { %294 = vst [vmem:[%s188_s4 + $0x30] sm:$0xff] %v286_v5  ;;  %295 = vst [vmem:[%s188_s4 + $0x38] sm:$0xff] %v287_v6 }
 0x198   : > { %292 = vst [vmem:[%s188_s4 + $0x20] sm:$0xff] %v284_v0  ;;  %293 = vst [vmem:[%s188_s4 + $0x28] sm:$0xff] %v285_v1 }
 0x199   : > { %512 = shalt.err (!%p509_p2)
}
 0x19a   : > { %s513_s26 = scalar_lea.hbm %s775_s17, 1024  ;;  %s517_s29 = scalar_lea.hbm %s826_s3, 2048 }
 0x19b   : > { %p514_p4 = scmp.ne.s32.totalorder %s775_s17, %s513_s26  ;;  %p518_p9 = scmp.lt.u32.totalorder %s775_s17, %s826_s3 }
 0x19c   : > { %p519_p1 = scmp.lt.u32.totalorder %s517_s29, %s513_s26  ;;  %p521_p6 = scmp.lt.u32.totalorder %s513_s26, %s775_s17 }
 0x19d   : > { %p515_p5 = pnand %p514_p4, %p833_p11 }
 0x19e   : > { %p520_p3 = por %p519_p1, %p518_p9 }
 0x19f   : > { %p516_p7 = pneg %p515_p5 }
 0x1a0   : > { %p522_p12 = por %p521_p6, %p520_p3 }
 0x1a2   : > { %p523_p13 = pnand %p522_p12, %p516_p7 }
 0x1a4   : > { %526 = shalt.err (!%p523_p13)
}
 0x1a5   : > { %s571_s11 = smov 256   ;;  %s572_s23 = smov 16  }
 0x1a6   : > { %405 = dma.vmem_to_hbm [thread:$0]  (%p833_p11), %s777_s6, 1024, %s775_s17, %s297_s16, %s571_s11, %s571_s11, %s572_s23  }
 0x1a7 PF: > { %s325_s4 = sand.u32 1, %s553_s12   ;;  %p834_p8 = scmp.ne.s32.totalorder %s831_s25, 0 }
 0x1a8   : > { %p835_p10 = scmp.ge.s32.totalorder %s565_s15, 2  ;;  %s326_s7 = scalar_lea.sflag [#allocation4], %s325_s4 }
 0x1aa   : > { %p412_p0 = pnand %p835_p10, %p834_p8 }
 0x1ac   : > { %548 = dma.done.wait (!%p412_p0), %s326_s7, 1024  }
 0x1ad   : > { %550 = vsyncadd (!%p412_p0), %s326_s7, 4294966272  ;;  %p16_p2 = scmp.ge.s32.totalorder %s618_s18, 4   ;;  %s836_s12 = smov %s557_s13 }
 0x1ae   : > { %s837_s13 = smov %s561_s14  ;;  %s838_s14 = smov %s630_s21 }
 0x1af   : > { %s839_s15 = smov %s618_s18  ;;  %18 = sbr.rel (!%p16_p2) target bundleno = 5 (0x5), region = 77 }
 0x1b6   :  { %331 = vsyncpa [#allocation3], 1 }
 0x1b7   :  { %333 = vsyncpa [#allocation3 + $0x1], 1 }
 0x1b8   :  { %334 = vsyncpa [#allocation4], 1 }
 0x1b9   :  { %336 = vsyncpa [#allocation4 + $0x1], 1 }

</bundles_post_ra>
